<compile_context>
chip_gen: v7x
topology: tpu7x:2x2x1
jax: 0.10.0
libtpu: 0.0.40
codegen_flags: <defaults>
</compile_context>

<pallas_src>
import jax
import jax.numpy as jnp
from jax import lax
from jax.experimental import pallas as pl
from jax.experimental.pallas import tpu as pltpu


def _fold_bn(gamma, beta, mean, var, eps=1e-5):
    scale = gamma / jnp.sqrt(var + eps)
    shift = beta - mean * scale
    return scale.astype(jnp.float32), shift.astype(jnp.float32)


def _toeplitz_weights(w_oihw, W):
    """PyTorch OIHW 3x3 conv weights -> per-dh block-Toeplitz matmul weights.

    Returns bf16 (3, (W+2)*Cin, W*Cout) such that, for a lane-packed padded
    input row x_row[p*Cin + ci] (p = padded column index):
        (x_row @ big[dh])[w*Cout + co] = sum_{dw,ci} x_row[(w+dw)*Cin+ci] * w[co,ci,dh,dw]
    i.e. the contribution of kernel row dh to output row's packed (W*Cout) lanes.
    """
    Cout, Cin = w_oihw.shape[0], w_oihw.shape[1]
    p = jnp.arange(W + 2)[:, None, None]
    wv = jnp.arange(W)[None, :, None]
    dv = jnp.arange(3)[None, None, :]
    sel = (p == wv + dv).astype(jnp.float32)                    # (W+2, W, 3)
    big = jnp.einsum('pwd,oihd->hpiwo', sel, w_oihw.astype(jnp.float32))
    return big.reshape(3, (W + 2) * Cin, W * Cout).astype(jnp.bfloat16)


def _make_kernel(H, W, Cmid, Cout):
    def kernel(x_ref, w1_ref, s1_ref, b1_ref, w2_ref, s2_ref, b2_ref,
               out_ref, mid_ref):
        # x_ref:   (1, H+2, (W+2)*Cin) bf16  lane-packed, zero-padded input
        # w1_ref:  (3, (W+2)*Cin,  W*Cmid) bf16   block-Toeplitz conv1 weights
        # s1/b1:   (1, W*Cmid) f32               folded BN1 scale/shift (tiled over W)
        # w2_ref:  (3, (W+2)*Cmid, W*Cout) bf16  block-Toeplitz conv2 weights
        # s2/b2:   (1, W*Cout) f32               folded BN2 scale/shift
        # out_ref: (1, H, W*Cout) f32            lane-dense output (W*Cout = 128 here)
        # mid_ref: (H+2, (W+2)*Cmid) f32 VMEM    h1 staged with its zero halo

        # ---- conv1: 3 lane-dense bf16 MXU matmuls (one per kernel row), f32 acc ----
        x = x_ref[0]                                            # (H+2, (W+2)*Cin) bf16
        y0 = jnp.dot(x, w1_ref[0], preferred_element_type=jnp.float32)
        y1 = jnp.dot(x, w1_ref[1], preferred_element_type=jnp.float32)
        y2 = jnp.dot(x, w1_ref[2], preferred_element_type=jnp.float32)
        # dh-shift applied on the f32 outputs (cheap 32-bit sublane-shifted adds).
        acc1 = y0[0:H] + y1[1:H + 1] + y2[2:H + 2]              # (H, W*Cmid)

        # folded BN1 + ReLU; Dropout(p=0.2) is identity in eval mode.
        h1 = jnp.maximum(acc1 * s1_ref[...] + b1_ref[...], 0.0)

        # ---- stage h1 with its zero halo (1 row top/bottom, Cmid lanes left/right).
        # Buffer is ~10 KB; a full zero + interior store is cheaper than several
        # narrow masked halo stores and is safe under "parallel" grid semantics.
        mid_ref[...] = jnp.zeros_like(mid_ref)
        mid_ref[1:H + 1, Cmid:(W + 1) * Cmid] = h1

        # ---- conv2: same 3-matmul structure on the padded h1 ----
        m = mid_ref[...].astype(jnp.bfloat16)                   # (H+2, (W+2)*Cmid)
        z0 = jnp.dot(m, w2_ref[0], preferred_element_type=jnp.float32)
        z1 = jnp.dot(m, w2_ref[1], preferred_element_type=jnp.float32)
        z2 = jnp.dot(m, w2_ref[2], preferred_element_type=jnp.float32)
        acc2 = z0[0:H] + z1[1:H + 1] + z2[2:H + 2]              # (H, W*Cout)

        # folded BN2 + ReLU; lane-dense store.
        out_ref[0] = jnp.maximum(acc2 * s2_ref[...] + b2_ref[...], 0.0)

    return kernel


def double_conv_pallas(x_nchw, params):
    """x_nchw: (N, Cin, H, W) float32. Returns (N, Cout, H, W) float32."""
    w1, g1, b1, m1, v1, w2, g2, b2, m2, v2 = params
    N, Cin, H, W = x_nchw.shape
    Cmid = w1.shape[0]
    Cout = w2.shape[0]

    # NCHW -> NHWC -> zero-pad 1 row/col each side -> lane-pack rows as (W+2)*Cin.
    x_nhwc = jnp.transpose(x_nchw, (0, 2, 3, 1)).astype(jnp.bfloat16)
    x_pad = jnp.pad(x_nhwc, ((0, 0), (1, 1), (1, 1), (0, 0)))
    x2d = x_pad.reshape(N, H + 2, (W + 2) * Cin)

    # Block-Toeplitz weights (built once, bf16 for the MXU).
    w1big = _toeplitz_weights(w1, W)                  # (3, (W+2)*Cin,  W*Cmid)
    w2big = _toeplitz_weights(w2, W)                  # (3, (W+2)*Cmid, W*Cout)

    # Folded BN, tiled across W to match the lane-packed (w*C + c) layout.
    s1, sh1 = _fold_bn(g1, b1, m1, v1)
    s2, sh2 = _fold_bn(g2, b2, m2, v2)
    s1p = jnp.tile(s1, W).reshape(1, W * Cmid)
    sh1p = jnp.tile(sh1, W).reshape(1, W * Cmid)
    s2p = jnp.tile(s2, W).reshape(1, W * Cout)
    sh2p = jnp.tile(sh2, W).reshape(1, W * Cout)

    # Advisory cost: actual MXU work with the block-Toeplitz weights.
    flops = 2 * N * 3 * (H + 2) * ((W + 2) * Cin * W * Cmid
                                   + (W + 2) * Cmid * W * Cout)
    bytes_accessed = (x2d.size * 2 + w1big.size * 2 + w2big.size * 2
                      + N * H * W * Cout * 4)
    cost = pl.CostEstimate(flops=flops, transcendentals=0,
                           bytes_accessed=bytes_accessed)

    # VMEM budget: double-buffered in/out blocks + weights + h1 scratch, 4x headroom.
    blk_bytes = (2 * (H + 2) * (W + 2) * Cin * 2          # x block (bf16), 2 bufs
                 + 2 * H * W * Cout * 4                    # out block (f32), 2 bufs
                 + w1big.size * 2 + w2big.size * 2         # weights (bf16)
                 + (H + 2) * (W + 2) * Cmid * 4            # mid scratch (f32)
                 + 4 * max(W * Cmid, W * Cout) * 4)        # scale/shift rows
    vmem_limit = int(min(64 * 1024 * 1024, max(4 * 1024 * 1024, 4 * blk_bytes)))

    # grid=(N,) -> N=2 parallel steps (keeps both v7x TensorCores busy); for N==1
    # or large images you would additionally split H/W into strips.
    out_packed = pl.pallas_call(
        _make_kernel(H, W, Cmid, Cout),
        out_shape=jax.ShapeDtypeStruct((N, H, W * Cout), jnp.float32),
        grid_spec=pltpu.PrefetchScalarGridSpec(
            num_scalar_prefetch=0,
            grid=(N,),
            in_specs=[
                pl.BlockSpec((1, H + 2, (W + 2) * Cin), lambda n: (n, 0, 0)),
                pl.BlockSpec((3, (W + 2) * Cin, W * Cmid), lambda n: (0, 0, 0)),
                pl.BlockSpec((1, W * Cmid), lambda n: (0, 0)),
                pl.BlockSpec((1, W * Cmid), lambda n: (0, 0)),
                pl.BlockSpec((3, (W + 2) * Cmid, W * Cout), lambda n: (0, 0, 0)),
                pl.BlockSpec((1, W * Cout), lambda n: (0, 0)),
                pl.BlockSpec((1, W * Cout), lambda n: (0, 0)),
            ],
            out_specs=pl.BlockSpec((1, H, W * Cout), lambda n: (n, 0, 0)),
            scratch_shapes=[
                pltpu.VMEM((H + 2, (W + 2) * Cmid), jnp.float32),   # padded h1
            ],
        ),
        compiler_params=pltpu.CompilerParams(
            dimension_semantics=("parallel",),
            vmem_limit_bytes=vmem_limit,
        ),
        cost_estimate=cost,
    )(x2d, w1big, s1p, sh1p, w2big, s2p, sh2p)

    # (N, H, W*Cout) -> NHWC -> NCHW to match the PyTorch interface.
    out_nhwc = out_packed.reshape(N, H, W, Cout)
    return jnp.transpose(out_nhwc, (0, 3, 1, 2))


def double_conv_ref(x_nchw, params, eps=1e-5):
    """Pure-JAX reference matching PyTorch DoubleConv in eval mode (NCHW, f32)."""
    w1, g1, b1, m1, v1, w2, g2, b2, m2, v2 = params

    def conv(x, w):
        return lax.conv_general_dilated(
            x, w, window_strides=(1, 1), padding=((1, 1), (1, 1)),
            dimension_numbers=("NCHW", "OIHW", "NCHW"))

    def bn(x, g, b, m, v):
        return (x - m[None, :, None, None]) / jnp.sqrt(v[None, :, None, None] + eps) \
               * g[None, :, None, None] + b[None, :, None, None]

    h = jnp.maximum(bn(conv(x_nchw, w1), g1, b1, m1, v1), 0.0)
    # dropout in eval mode: identity
    return jnp.maximum(bn(conv(h, w2), g2, b2, m2, v2), 0.0)


def make_params(key, in_channels, out_channels, mid_channels=None):
    if mid_channels is None:
        mid_channels = out_channels
    ks = jax.random.split(key, 10)
    w1 = jax.random.normal(ks[0], (mid_channels, in_channels, 3, 3), jnp.float32) * 0.1
    g1 = jax.random.uniform(ks[1], (mid_channels,), jnp.float32, 0.5, 1.5)
    b1 = jax.random.normal(ks[2], (mid_channels,), jnp.float32) * 0.1
    m1 = jax.random.normal(ks[3], (mid_channels,), jnp.float32) * 0.1
    v1 = jax.random.uniform(ks[4], (mid_channels,), jnp.float32, 0.5, 1.5)
    w2 = jax.random.normal(ks[5], (out_channels, mid_channels, 3, 3), jnp.float32) * 0.1
    g2 = jax.random.uniform(ks[6], (out_channels,), jnp.float32, 0.5, 1.5)
    b2 = jax.random.normal(ks[7], (out_channels,), jnp.float32) * 0.1
    m2 = jax.random.normal(ks[8], (out_channels,), jnp.float32) * 0.1
    v2 = jax.random.uniform(ks[9], (out_channels,), jnp.float32, 0.5, 1.5)
    return (w1, g1, b1, m1, v1, w2, g2, b2, m2, v2)


if __name__ == "__main__":
    key = jax.random.PRNGKey(0)
    k_x, k_p = jax.random.split(key)

    N, Cin, H, W = 2, 4, 16, 16
    Cout = 8  # mid_channels defaults to out_channels; W*Cout = 128 (lane-dense)

    x = jax.random.normal(k_x, (N, Cin, H, W), jnp.float32)
    params = make_params(k_p, Cin, Cout)

    out = double_conv_pallas(x, params)
    out = jax.block_until_ready(out)

    ref = double_conv_ref(x, params)
    assert out.shape == (N, Cout, H, W), out.shape
    max_err = float(jnp.max(jnp.abs(out - ref)))
    # bf16 MXU inputs with f32 accumulation -> looser tolerance than pure f32.
    assert jnp.allclose(out, ref, rtol=5e-2, atol=5e-2), max_err

    print("KERNEL_OK")
</pallas_src>

<mosaic_0001>
module attributes {stable_mosaic.version = 11 : i64} {
  func.func @kernel(%arg0: i32, %arg1: memref<1x18x72xbf16, #tpu.memory_space<vmem>>, %arg2: memref<3x72x128xbf16, #tpu.memory_space<vmem>>, %arg3: memref<1x128xf32, #tpu.memory_space<vmem>>, %arg4: memref<1x128xf32, #tpu.memory_space<vmem>>, %arg5: memref<3x144x128xbf16, #tpu.memory_space<vmem>>, %arg6: memref<1x128xf32, #tpu.memory_space<vmem>>, %arg7: memref<1x128xf32, #tpu.memory_space<vmem>>, %arg8: memref<1x16x128xf32, #tpu.memory_space<vmem>>, %arg9: memref<18x144xf32, #tpu.memory_space<vmem>>) attributes {dimension_semantics = [#tpu.dimension_semantics<parallel>], iteration_bounds = array<i64: 2>, scalar_prefetch = 0 : i64, scratch_operands = 1 : i64, tpu.core_type = #tpu.core_type<tc>, window_params = [{transform_indices = @transform_0, window_bounds = array<i64: 1, 18, 72>}, {pipeline_mode = #tpu.pipeline_mode<synchronous>, transform_indices = @transform_1, window_bounds = array<i64: 3, 72, 128>}, {pipeline_mode = #tpu.pipeline_mode<synchronous>, transform_indices = @transform_2, window_bounds = array<i64: 1, 128>}, {pipeline_mode = #tpu.pipeline_mode<synchronous>, transform_indices = @transform_3, window_bounds = array<i64: 1, 128>}, {pipeline_mode = #tpu.pipeline_mode<synchronous>, transform_indices = @transform_4, window_bounds = array<i64: 3, 144, 128>}, {pipeline_mode = #tpu.pipeline_mode<synchronous>, transform_indices = @transform_5, window_bounds = array<i64: 1, 128>}, {pipeline_mode = #tpu.pipeline_mode<synchronous>, transform_indices = @transform_6, window_bounds = array<i64: 1, 128>}, {transform_indices = @transform_7, window_bounds = array<i64: 1, 16, 128>}]} {
    %c0 = arith.constant 0 : index
    %c0_0 = arith.constant 0 : index
    %c0_1 = arith.constant 0 : index
    %0 = vector.load %arg1[%c0, %c0_0, %c0_1] : memref<1x18x72xbf16, #tpu.memory_space<vmem>>, vector<1x18x72xbf16>
    %1 = vector.shape_cast %0 : vector<1x18x72xbf16> to vector<18x72xbf16>
    %c0_2 = arith.constant 0 : index
    %c0_3 = arith.constant 0 : index
    %c0_4 = arith.constant 0 : index
    %2 = vector.load %arg2[%c0_2, %c0_3, %c0_4] : memref<3x72x128xbf16, #tpu.memory_space<vmem>>, vector<1x72x128xbf16>
    %3 = vector.shape_cast %2 : vector<1x72x128xbf16> to vector<72x128xbf16>
    %cst = arith.constant dense<0.000000e+00> : vector<18x128xf32>
    %4 = tpu.matmul %1, %3, %cst {dimension_numbers = #tpu.dot_dimension_numbers<[1], [0], [0], [1], [0, 0, 1, 1], [], []>} : vector<18x72xbf16>, vector<72x128xbf16>, vector<18x128xf32> -> vector<18x128xf32>
    %c1 = arith.constant 1 : index
    %c0_5 = arith.constant 0 : index
    %c0_6 = arith.constant 0 : index
    %5 = vector.load %arg2[%c1, %c0_5, %c0_6] : memref<3x72x128xbf16, #tpu.memory_space<vmem>>, vector<1x72x128xbf16>
    %6 = vector.shape_cast %5 : vector<1x72x128xbf16> to vector<72x128xbf16>
    %cst_7 = arith.constant dense<0.000000e+00> : vector<18x128xf32>
    %7 = tpu.matmul %1, %6, %cst_7 {dimension_numbers = #tpu.dot_dimension_numbers<[1], [0], [0], [1], [0, 0, 1, 1], [], []>} : vector<18x72xbf16>, vector<72x128xbf16>, vector<18x128xf32> -> vector<18x128xf32>
    %c2 = arith.constant 2 : index
    %c0_8 = arith.constant 0 : index
    %c0_9 = arith.constant 0 : index
    %8 = vector.load %arg2[%c2, %c0_8, %c0_9] : memref<3x72x128xbf16, #tpu.memory_space<vmem>>, vector<1x72x128xbf16>
    %9 = vector.shape_cast %8 : vector<1x72x128xbf16> to vector<72x128xbf16>
    %cst_10 = arith.constant dense<0.000000e+00> : vector<18x128xf32>
    %10 = tpu.matmul %1, %9, %cst_10 {dimension_numbers = #tpu.dot_dimension_numbers<[1], [0], [0], [1], [0, 0, 1, 1], [], []>} : vector<18x72xbf16>, vector<72x128xbf16>, vector<18x128xf32> -> vector<18x128xf32>
    %11 = vector.extract_strided_slice %4 {offsets = [0, 0], sizes = [16, 128], strides = [1, 1]} : vector<18x128xf32> to vector<16x128xf32>
    %12 = vector.extract_strided_slice %7 {offsets = [1, 0], sizes = [16, 128], strides = [1, 1]} : vector<18x128xf32> to vector<16x128xf32>
    %13 = arith.addf %11, %12 : vector<16x128xf32>
    %14 = vector.extract_strided_slice %10 {offsets = [2, 0], sizes = [16, 128], strides = [1, 1]} : vector<18x128xf32> to vector<16x128xf32>
    %15 = arith.addf %13, %14 : vector<16x128xf32>
    %c0_11 = arith.constant 0 : index
    %c0_12 = arith.constant 0 : index
    %16 = vector.load %arg3[%c0_11, %c0_12] : memref<1x128xf32, #tpu.memory_space<vmem>>, vector<1x128xf32>
    %17 = vector.broadcast %16 : vector<1x128xf32> to vector<16x128xf32>
    %18 = arith.mulf %15, %17 : vector<16x128xf32>
    %c0_13 = arith.constant 0 : index
    %c0_14 = arith.constant 0 : index
    %19 = vector.load %arg4[%c0_13, %c0_14] : memref<1x128xf32, #tpu.memory_space<vmem>>, vector<1x128xf32>
    %20 = vector.broadcast %19 : vector<1x128xf32> to vector<16x128xf32>
    %21 = arith.addf %18, %20 : vector<16x128xf32>
    %cst_15 = arith.constant 0.000000e+00 : f32
    %22 = vector.broadcast %cst_15 : f32 to vector<16x128xf32>
    %23 = arith.maximumf %21, %22 : vector<16x128xf32>
    %cst_16 = arith.constant 0.000000e+00 : f32
    %24 = vector.broadcast %cst_16 : f32 to vector<18x144xf32>
    %c0_17 = arith.constant 0 : index
    %c0_18 = arith.constant 0 : index
    %25 = vector.load %arg9[%c0_17, %c0_18] : memref<18x144xf32, #tpu.memory_space<vmem>>, vector<18x144xf32>
    tpu.vector_store %arg9[%c0_17, %c0_18], %24 {strides = array<i32>} : memref<18x144xf32, #tpu.memory_space<vmem>>, vector<18x144xf32>,
    %c1_19 = arith.constant 1 : index
    %c8 = arith.constant 8 : index
    %26 = vector.load %arg9[%c1_19, %c8] : memref<18x144xf32, #tpu.memory_space<vmem>>, vector<16x128xf32>
    tpu.vector_store %arg9[%c1_19, %c8], %23 {strides = array<i32>} : memref<18x144xf32, #tpu.memory_space<vmem>>, vector<16x128xf32>,
    %c0_20 = arith.constant 0 : index
    %c0_21 = arith.constant 0 : index
    %27 = vector.load %arg9[%c0_20, %c0_21] : memref<18x144xf32, #tpu.memory_space<vmem>>, vector<18x144xf32>
    %28 = arith.truncf %27 : vector<18x144xf32> to vector<18x144xbf16>
    %c0_22 = arith.constant 0 : index
    %c0_23 = arith.constant 0 : index
    %c0_24 = arith.constant 0 : index
    %29 = vector.load %arg5[%c0_22, %c0_23, %c0_24] : memref<3x144x128xbf16, #tpu.memory_space<vmem>>, vector<1x144x128xbf16>
    %30 = vector.shape_cast %29 : vector<1x144x128xbf16> to vector<144x128xbf16>
    %cst_25 = arith.constant dense<0.000000e+00> : vector<18x128xf32>
    %31 = tpu.matmul %28, %30, %cst_25 {dimension_numbers = #tpu.dot_dimension_numbers<[1], [0], [0], [1], [0, 0, 1, 1], [], []>} : vector<18x144xbf16>, vector<144x128xbf16>, vector<18x128xf32> -> vector<18x128xf32>
    %c1_26 = arith.constant 1 : index
    %c0_27 = arith.constant 0 : index
    %c0_28 = arith.constant 0 : index
    %32 = vector.load %arg5[%c1_26, %c0_27, %c0_28] : memref<3x144x128xbf16, #tpu.memory_space<vmem>>, vector<1x144x128xbf16>
    %33 = vector.shape_cast %32 : vector<1x144x128xbf16> to vector<144x128xbf16>
    %cst_29 = arith.constant dense<0.000000e+00> : vector<18x128xf32>
    %34 = tpu.matmul %28, %33, %cst_29 {dimension_numbers = #tpu.dot_dimension_numbers<[1], [0], [0], [1], [0, 0, 1, 1], [], []>} : vector<18x144xbf16>, vector<144x128xbf16>, vector<18x128xf32> -> vector<18x128xf32>
    %c2_30 = arith.constant 2 : index
    %c0_31 = arith.constant 0 : index
    %c0_32 = arith.constant 0 : index
    %35 = vector.load %arg5[%c2_30, %c0_31, %c0_32] : memref<3x144x128xbf16, #tpu.memory_space<vmem>>, vector<1x144x128xbf16>
    %36 = vector.shape_cast %35 : vector<1x144x128xbf16> to vector<144x128xbf16>
    %cst_33 = arith.constant dense<0.000000e+00> : vector<18x128xf32>
    %37 = tpu.matmul %28, %36, %cst_33 {dimension_numbers = #tpu.dot_dimension_numbers<[1], [0], [0], [1], [0, 0, 1, 1], [], []>} : vector<18x144xbf16>, vector<144x128xbf16>, vector<18x128xf32> -> vector<18x128xf32>
    %38 = vector.extract_strided_slice %31 {offsets = [0, 0], sizes = [16, 128], strides = [1, 1]} : vector<18x128xf32> to vector<16x128xf32>
    %39 = vector.extract_strided_slice %34 {offsets = [1, 0], sizes = [16, 128], strides = [1, 1]} : vector<18x128xf32> to vector<16x128xf32>
    %40 = arith.addf %38, %39 : vector<16x128xf32>
    %41 = vector.extract_strided_slice %37 {offsets = [2, 0], sizes = [16, 128], strides = [1, 1]} : vector<18x128xf32> to vector<16x128xf32>
    %42 = arith.addf %40, %41 : vector<16x128xf32>
    %c0_34 = arith.constant 0 : index
    %c0_35 = arith.constant 0 : index
    %43 = vector.load %arg6[%c0_34, %c0_35] : memref<1x128xf32, #tpu.memory_space<vmem>>, vector<1x128xf32>
    %44 = vector.broadcast %43 : vector<1x128xf32> to vector<16x128xf32>
    %45 = arith.mulf %42, %44 : vector<16x128xf32>
    %c0_36 = arith.constant 0 : index
    %c0_37 = arith.constant 0 : index
    %46 = vector.load %arg7[%c0_36, %c0_37] : memref<1x128xf32, #tpu.memory_space<vmem>>, vector<1x128xf32>
    %47 = vector.broadcast %46 : vector<1x128xf32> to vector<16x128xf32>
    %48 = arith.addf %45, %47 : vector<16x128xf32>
    %cst_38 = arith.constant 0.000000e+00 : f32
    %49 = vector.broadcast %cst_38 : f32 to vector<16x128xf32>
    %50 = arith.maximumf %48, %49 : vector<16x128xf32>
    %c0_39 = arith.constant 0 : index
    %c0_40 = arith.constant 0 : index
    %c0_41 = arith.constant 0 : index
    %51 = vector.load %arg8[%c0_39, %c0_40, %c0_41] : memref<1x16x128xf32, #tpu.memory_space<vmem>>, vector<1x16x128xf32>
    %52 = vector.shape_cast %51 : vector<1x16x128xf32> to vector<16x128xf32>
    %53 = vector.shape_cast %50 : vector<16x128xf32> to vector<1x16x128xf32>
    tpu.vector_store %arg8[%c0_39, %c0_40, %c0_41], %53 {strides = array<i32>} : memref<1x16x128xf32, #tpu.memory_space<vmem>>, vector<1x16x128xf32>,
    return
  }
  func.func @transform_0(%arg0: i32) -> (i32, i32, i32) {
    %c0_i32 = arith.constant 0 : i32
    %c0_i32_0 = arith.constant 0 : i32
    %c0_i32_1 = arith.constant 0 : i32
    return %arg0, %c0_i32, %c0_i32_0 : i32, i32, i32
  }
  func.func @transform_1(%arg0: i32) -> (i32, i32, i32) {
    %c0_i32 = arith.constant 0 : i32
    %c0_i32_0 = arith.constant 0 : i32
    %c0_i32_1 = arith.constant 0 : i32
    %c0_i32_2 = arith.constant 0 : i32
    return %c0_i32, %c0_i32_0, %c0_i32_1 : i32, i32, i32
  }
  func.func @transform_2(%arg0: i32) -> (i32, i32) {
    %c0_i32 = arith.constant 0 : i32
    %c0_i32_0 = arith.constant 0 : i32
    %c0_i32_1 = arith.constant 0 : i32
    return %c0_i32, %c0_i32_0 : i32, i32
  }
  func.func @transform_3(%arg0: i32) -> (i32, i32) {
    %c0_i32 = arith.constant 0 : i32
    %c0_i32_0 = arith.constant 0 : i32
    %c0_i32_1 = arith.constant 0 : i32
    return %c0_i32, %c0_i32_0 : i32, i32
  }
  func.func @transform_4(%arg0: i32) -> (i32, i32, i32) {
    %c0_i32 = arith.constant 0 : i32
    %c0_i32_0 = arith.constant 0 : i32
    %c0_i32_1 = arith.constant 0 : i32
    %c0_i32_2 = arith.constant 0 : i32
    return %c0_i32, %c0_i32_0, %c0_i32_1 : i32, i32, i32
  }
  func.func @transform_5(%arg0: i32) -> (i32, i32) {
    %c0_i32 = arith.constant 0 : i32
    %c0_i32_0 = arith.constant 0 : i32
    %c0_i32_1 = arith.constant 0 : i32
    return %c0_i32, %c0_i32_0 : i32, i32
  }
  func.func @transform_6(%arg0: i32) -> (i32, i32) {
    %c0_i32 = arith.constant 0 : i32
    %c0_i32_0 = arith.constant 0 : i32
    %c0_i32_1 = arith.constant 0 : i32
    return %c0_i32, %c0_i32_0 : i32, i32
  }
  func.func @transform_7(%arg0: i32) -> (i32, i32, i32) {
    %c0_i32 = arith.constant 0 : i32
    %c0_i32_0 = arith.constant 0 : i32
    %c0_i32_1 = arith.constant 0 : i32
    return %arg0, %c0_i32, %c0_i32_0 : i32, i32, i32
  }
}

</mosaic_0001>

<bundles_post_ra>
// kernel: tpu_custom_call.1
= control target key start
LH: loop header
LB: loop body
LE: loop exit
PB: predicated region body
PF: predicated region fallthrough
CT: control target
= control target key end

     0   :  { %12 = vsyncpa [#allocation4], 0  ;;  %s1873_s0 = inlined_call_operand.vmem [shape: bf16[2,18,72], index: 0, kind: input, shape index: {}]   ;;  %s1874_s1 = inlined_call_operand.hbm [shape: bf16[3,72,128], index: 1, kind: input, shape index: {}]   ;;  %s1875_s2 = inlined_call_operand.vmem [shape: f32[1,128], index: 2, kind: input, shape index: {}]   ;;  %s1876_s3 = inlined_call_operand.vmem [shape: f32[1,128], index: 3, kind: input, shape index: {}]   ;;  %s1877_s4 = inlined_call_operand.hbm [shape: bf16[3,144,128], index: 4, kind: input, shape index: {}]   ;;  %s1878_s5 = inlined_call_operand.vmem [shape: f32[1,128], index: 5, kind: input, shape index: {}]   ;;  %s1879_s6 = inlined_call_operand.vmem [shape: f32[1,128], index: 6, kind: input, shape index: {}]   ;;  %s1880_s7 = inlined_call_operand.hbm [shape: f32[2,16,128], index: 7, kind: output, shape index: {}]  }
   0x1   :  { %13 = vsyncpa [#allocation7], 0 }
   0x2   :  { %14 = vsyncpa [#allocation5], 0 }
   0x3   :  { %16 = vsyncpa [#allocation5 + $0x1], 0  ;;  %s1621_s24 = smov 0   ;;  %s1623_s25 = smov 0  }
   0x4   :  { %s1625_s26 = smov 0   ;;  %s1627_s27 = smov 0  }
   0x5 LB: > { %s1642_s28 = sadd.s32 4294967295, %s1570_s27   ;;  %s1191_s29 = sadd.s32 4294967294, %s1570_s27   ;;  %s1570_s27 = sphi %s1627_s27, %s1900_s27   ;;  %s1566_s26 = sphi %s1625_s26, %s1899_s26   ;;  %s1562_s25 = sphi %s1623_s25, %s1898_s25   ;;  %s1558_s24 = sphi %s1621_s24, %s1897_s24  }
   0x6   : > { %s1646_s30 = sadd.s32 1, %s1570_s27   ;;  %s181_s8 = sadd.s32 1, %s1566_s26 }
   0x7   : > { %s178_s9 = ssub.s32 %s1570_s27, %s1646_s30  ;;  %p191_p0 = scmp.ne.s32.totalorder %s1566_s26, %s1562_s25 }
   0x8   : > { %p179_p1 = scmp.eq.s32.totalorder %s178_s9, 0  ;;  %p192_p2 = scmp.eq.s32.totalorder %s1642_s28, 1 }
   0x9   : > { %p197_p3 = scmp.ne.s32.totalorder %s1562_s25, %s1558_s24  ;;  %p198_p4 = scmp.eq.s32.totalorder %s1191_s29, 1 }
   0xa   : > { %s1657_s10 = scalar_select %p179_p1, %s1566_s26, %s181_s8  }
   0xb   : > { %p1659_p5 = por %p192_p2, %p191_p0  ;;  %p1663_p6 = por %p198_p4, %p197_p3 }
   0xc   : > { %1884 = sst [smem:[#allocation12_spill]] %s1657_s10  ;;  %p1192_p7 = scmp.ge.s32.totalorder %s1570_s27, 1 }
   0xd   : > { %s1885_s11 = scalar_select %p1659_p5, 1, 0 }
   0xe   : > { %s1886_s12 = scalar_select %p1663_p6, 1, 0 }
   0xf   : > { %p205_p8 = scmp.lt.s32.totalorder %s1570_s27, 3  ;;  %p1881_p9 = scmp.eq.s32.totalorder %s1642_s28, 0 }
  0x10   : > { %s1572_s14 = smov [#allocation3]   ;;  %s1573_s17 = smov [#allocation6]  }
  0x11   : > { %p1670_p10 = pnand %p1192_p7, %p205_p8  ;;  %s217_s15 = sshll.u32 %s1572_s14, 4  ;;  %s218_s15 = int_to_ptr.vmem [resolvable:$true] %s217_s15 }
  0x12   : > { %s236_s18 = sshll.u32 %s1573_s17, 4  ;;  %s1444_s21 = scalar_lea.hbm %s1874_s1, 1728  ;;  %s1682_s18 = int_to_ptr.vmem [resolvable:$true] %s236_s18 }
  0x13   : > { %s1887_s13 = scalar_select %p1670_p10, 1, 0 }
  0x14   : > { %p1344_p11 = pneg %p1670_p10  ;;  %p1445_p13 = scmp.ne.s32.totalorder %s1874_s1, %s1444_s21 }
  0x15   : > { %p1451_p3 = scmp.lt.u32.totalorder %s1444_s21, %s1874_s1 }
  0x16   : > { %p1678_p12 = pnand %p1881_p9, %p1344_p11 }
  0x18   : > { %p1446_p0 = pneg %p1678_p12 }
  0x1a   : > { %p1447_p1 = pnand %p1446_p0, %p1445_p13 }
  0x1c   : > { %p1448_p2 = pneg %p1447_p1 }
  0x1e   : > { %p1453_p4 = pnand %p1451_p3, %p1448_p2 }
  0x20   : > { %1456 = shalt.err (!%p1453_p4)
}
  0x21   : > { %s1457_s9 = scalar_lea.vmem %s218_s15, 1728  ;;  %p1465_p9 = scmp.lt.s32.totalorder %s218_s15, %s218_s15 }
  0x22   : > { %p1458_p7 = scmp.ne.s32.totalorder %s218_s15, %s1457_s9  ;;  %p1466_p6 = scmp.lt.s32.totalorder %s1457_s9, %s1457_s9 }
  0x24   : > { %p1460_p8 = pnand %p1458_p7, %p1446_p0  ;;  %p1467_p5 = por %p1466_p6, %p1465_p9 }
  0x26   : > { %p1461_p11 = pneg %p1460_p8 }
  0x28   : > { %p1468_p10 = pnand %p1467_p5, %p1461_p11 }
  0x2a   : > { %1471 = shalt.err (!%p1468_p10)
}
  0x2b   : > { %s1574_s14 = smov 64   ;;  %s1575_s17 = smov 4  }
  0x2c   : > { %1347 = dma.hbm_to_vmem [thread:$0]  (!%p1678_p12), %s1874_s1, 1728, %s218_s15, [#allocation4], %s1574_s14, %s1574_s14, %s1575_s17  }
  0x2d   : > { %s1472_s23 = scalar_lea.hbm %s1877_s4, 3456 }
  0x2e   : > { %p1473_p13 = scmp.ne.s32.totalorder %s1877_s4, %s1472_s23  ;;  %p1479_p9 = scmp.lt.u32.totalorder %s1472_s23, %s1877_s4 }
  0x30   : > { %p1475_p5 = pnand %p1473_p13, %p1446_p0 }
  0x32   : > { %p1476_p6 = pneg %p1475_p5 }
  0x34   : > { %p1481_p10 = pnand %p1479_p9, %p1476_p6 }
  0x36   : > { %1484 = shalt.err (!%p1481_p10)
}
  0x37   : > { %s1485_s15 = scalar_lea.vmem %s1682_s18, 3456  ;;  %p1493_p4 = scmp.lt.s32.totalorder %s1682_s18, %s1682_s18 }
  0x38   : > { %p1486_p1 = scmp.ne.s32.totalorder %s1682_s18, %s1485_s15  ;;  %p1494_p7 = scmp.lt.s32.totalorder %s1485_s15, %s1485_s15 }
  0x3a   : > { %p1488_p2 = pnand %p1486_p1, %p1446_p0  ;;  %p1495_p8 = por %p1494_p7, %p1493_p4 }
  0x3c   : > { %p1489_p3 = pneg %p1488_p2 }
  0x3e   : > { %p1496_p11 = pnand %p1495_p8, %p1489_p3 }
  0x40   : > { %1499 = shalt.err (!%p1496_p11)
}
  0x41   : > { %1350 = dma.hbm_to_vmem [thread:$0]  (!%p1678_p12), %s1877_s4, 3456, %s1682_s18, [#allocation7], %s1574_s14, %s1574_s14, %s1575_s17  }
  0x42   : > { %p1889_p13 = scmp.ne.s32.totalorder %s1887_s13, 0 }
  0x43   : > { %p1890_p5 = scmp.eq.s32.totalorder (!%p1889_p13), %s1642_s28, 0 }
  0x44   : > { %266 = sbr.rel (%p1889_p13) target bundleno = 762 (0x2fa), region = 48 }
  0x4b   : > { %1545 = dma.done.wait (%p1890_p5), [#allocation4], 1728   ;;  %p1891_p0 = pmov %p1890_p5 }
  0x4d   : > { %1547 = vsyncadd (%p1891_p0), [#allocation4], 4294965568  ;;  %p1892_p6 = pmov %p1891_p0 }
  0x4e   : > { %p1893_p9 = pmov %p1891_p0 }
  0x4f   : > { %1549 = dma.done.wait (%p1892_p6), [#allocation7], 3456  }
  0x50   : > { %1551 = vsyncadd (%p1893_p9), [#allocation7], 4294963840  ;;  %p302_p10 = scmp.lt.s32.totalorder %s1642_s28, 1  ;;  %v1400_v0 = vld [vmem:[#allocation3] sm:$0xff]   ;;  %v1402_v2 = vld [vmem:[#allocation3 + $0x8] sm:$0xff]   ;;  %vm355_vm0 = vcmask 588800  }
  0x51   : > { %v1401_v1 = vld [vmem:[#allocation3 + $0x24] sm:$0xff]   ;;  %1288 = vmatprep.subr.bf16.mxu0 %v1400_v0  ;;  %v1403_v3 = vld [vmem:[#allocation3 + $0x2c] sm:$0xff]   ;;  %v1405_v5 = vld [vmem:[#allocation3 + $0x34] sm:$0xff]   ;;  %vm362_vm1 = vcmask 1043456   ;;  %vm641_vm2 = vcmask 123904   ;;  %v1576_v22 = vmov 0  }
  0x52   : > { %s303_s16 = scalar_select %p302_p10, %s1642_s28, 1  ;;  %1302 = vmatprep.subr.bf16.mxu1 %v1401_v1  ;;  %1289 = vmatpush3.bf16.msra.mxu0 %v1400_v0  ;;  %v1404_v4 = vld [vmem:[#allocation3 + $0x10] sm:$0xff]   ;;  %v1406_v6 = vld [vmem:[#allocation3 + $0x18] sm:$0xff]   ;;  %v1408_v9 = vld [vmem:[#allocation3 + $0x20] ss:$0 sps:$4 sm:$0xff]   ;;  %v1577_v23 = vmov 0.0  }
  0x53   : > { %1303 = vmatpush3.bf16.msra.mxu1 %v1401_v1  ;;  %1290 = vmatprep.subr.bf16.mxu0 %v1402_v2  ;;  %v1407_v7 = vld [vmem:[#allocation3 + $0x3c] sm:$0xff]   ;;  %v1409_v10 = vld [vmem:[#allocation3 + $0x44] ss:$0 sps:$4 sm:$0xff]   ;;  %v364_v11 = vsel %vm362_vm1, %v1408_v9, 0  ;;  %v1412_v12 = vld [vmem:[#allocation3 + $0x48] sm:$0xff]   ;;  %635 = vst [vmem:[#allocation2] sm:$0xff] %v1577_v23 }
  0x54   : > { %s1333_s13 = smul.u32 12, %s303_s16  ;;  %1304 = vmatprep.subr.bf16.mxu1 %v1403_v3  ;;  %v451_v14 = vsel %vm362_vm1, %v1409_v10, 0  ;;  %v1413_v15 = vld [vmem:[#allocation3 + $0x50] sm:$0xff]   ;;  %v1414_v16 = vld [vmem:[#allocation3 + $0x58] sm:$0xff]   ;;  %v1415_v17 = vld [vmem:[#allocation3 + $0x60] sm:$0xff]   ;;  %638 = vst [vmem:[#allocation2 + $0x10] sm:$0xff] %v1577_v23 }
  0x55   : > { %v1416_v18 = vld [vmem:[#allocation3 + $0x68] ss:$0 sps:$4 sm:$0xff]   ;;  %v1417_v20 = vld [vmem:[#allocation6] sm:$0xff]   ;;  %v1418_v21 = vld [vmem:[#allocation6 + $0x48] sm:$0xff]   ;;  %640 = vst [vmem:[#allocation2 + $0x20] sm:$0x3] %v1577_v23 }
  0x56   : > { %1291 = vmatpush3.bf16.msra.mxu0 %v1402_v2  ;;  %s306_s17 = scalar_lea.vmem %s1873_s0, %s1333_s13  ;;  %v539_v19 = vsel %vm362_vm1, %v1416_v18, 0  ;;  %642 = vst.msk [vmem:[#allocation2 + $0x28] sm:$0x3] %vm641_vm2, %v1577_v23  ;;  %v1419_v24 = vld [vmem:[#allocation6 + $0x8] sm:$0xff]   ;;  %v1420_v25 = vld [vmem:[#allocation6 + $0x50] sm:$0xff]   ;;  %v1422_v27 = vld [vmem:[#allocation6 + $0x58] sm:$0xff]  }
  0x57   : > { %1305 = vmatpush3.bf16.msra.mxu1 %v1403_v3  ;;  %1292 = vmatprep.subr.bf16.mxu0 %v1404_v4  ;;  %v1410_v8 = vld [vmem:[%s306_s17] sm:$0xff]   ;;  %v1411_v13 = vld [vmem:[%s306_s17 + $0x8] ss:$0 sps:$4 sm:$0x11]   ;;  %v1421_v26 = vld [vmem:[#allocation6 + $0x10] sm:$0xff]   ;;  %vm592_vm3 = vcmask 1046528  }
  0x58   : > { %1306 = vmatprep.subr.bf16.mxu1 %v1405_v5  ;;  %1298 = vmatprep.mubr.msk.bf16.mxu0 %vm355_vm0, %v1410_v8  ;;  %v1423_v28 = vld [vmem:[#allocation6 + $0x18] sm:$0xff]   ;;  %v1424_v29 = vld [vmem:[#allocation6 + $0x60] sm:$0xff]   ;;  %v1426_v31 = vld [vmem:[#allocation6 + $0x68] sm:$0xff]   ;;  %vm605_vm4 = vcmask 1045504   ;;  %vm636_vm5 = vcmask 130048   ;;  %vm645_vm6 = vcmask 1040384  }
  0x59   : > { %1312 = vmatprep.mubr.msk.bf16.mxu1 %vm355_vm0, %v1410_v8  ;;  %v1425_v30 = vld [vmem:[#allocation6 + $0x20] sm:$0xff]   ;;  %v1427_v32 = vld [vmem:[#allocation6 + $0x28] sm:$0xff]   ;;  %v1428_v52 = vld [vmem:[#allocation6 + $0x70] sm:$0xff]   ;;  %637 = vst.msk [vmem:[#allocation2 + $0x8] sm:$0xff] %vm636_vm5, %v1577_v23  ;;  %s1578_s29 = smov 8   ;;  %vm666_vm7 = vcmask 1040448  }
  0x5a   : > { %1293 = vmatpush3.bf16.msra.mxu0 %v1404_v4  ;;  %639 = vst.msk [vmem:[#allocation2 + $0x18] sm:$0xff] %vm636_vm5, %v1577_v23  ;;  %v1429_v56 = vld [vmem:[#allocation6 + $0x30] sm:$0xff]   ;;  %v1224_v59 = vld [vmem:[%s1875_s2] ss:$0 sm:$0xff]  ;;  %v1430_v62 = vld [vmem:[#allocation6 + $0x78] sm:$0xff]   ;;  %vm668_vm8 = vcmask 57344  }
  0x5b   : > { %1307 = vmatpush3.bf16.msra.mxu1 %v1405_v5  ;;  %1294 = vmatprep.subr.bf16.mxu0 %v1406_v6  ;;  %v1225_v63 = vld [vmem:[%s1876_s3] ss:$0 sm:$0xff]  ;;  %v1431_v0 = vld [vmem:[#allocation6 + $0x38] sm:$0xff]   ;;  %vm658_vm9 = vcmask 1047617   ;;  %vm660_vm10 = vcmask 64513   ;;  %vm662_vm11 = vcmask 1047616  }
  0x5c   : > { %1308 = vmatprep.subr.bf16.mxu1 %v1407_v7  ;;  %v1432_v3 = vld [vmem:[#allocation6 + $0x80] sm:$0xff]   ;;  %vm664_vm12 = vcmask 64512   ;;  %s299_s8 = sand.u32 1, %s1562_s25   ;;  %s1266_s18 = sshll.u32 %s1642_s28, 8 }
  0x5d   : > { %v1433_v4 = vld [vmem:[#allocation6 + $0x40] sm:$0xff]   ;;  %s1199_s16 = sshll.u32 %s299_s8, 4  ;;  %s1827_s21 = scalar_lea.hbm %s1880_s7, %s1266_s18 }
  0x5e   : > { %1295 = vmatpush3.bf16.msra.mxu0 %v1406_v6  ;;  %s301_s13 = scalar_lea.vmem [#allocation8], %s1199_s16  ;;  %s1831_s22 = scalar_lea.sflag [#allocation5], %s299_s8 }
  0x5f   : > { %1309 = vmatpush3.bf16.msra.mxu1 %v1407_v7  ;;  %1330 = vmatprep.subr.msk.bf16.mxu0 %vm362_vm1, %v1408_v9  ;;  %v1434_v9 = vld [vmem:[#allocation6 + $0x88] sm:$0xff]   ;;  %s1107_s14 = sshll.u32 %s301_s13, 4  ;;  %p1894_p1 = scmp.ne.s32.totalorder %s1885_s11, 0  ;;  %s1829_s14 = int_to_ptr.vmem [resolvable:$true] %s1107_s14 }
  0x60   : > { %1331 = vmatprep.subr.msk.bf16.mxu1 %vm362_vm1, %v1409_v10  ;;  %s1500_s23 = scalar_lea.vmem %s1829_s14, 256  ;;  %s1579_s28 = smov [#allocation8]  }
  0x61   : > { %p1501_p12 = scmp.ne.s32.totalorder %s1829_s14, %s1500_s23  ;;  %s1504_s9 = sshll.u32 %s1579_s28, 4  ;;  %s1505_s9 = int_to_ptr.vmem [resolvable:$false] %s1504_s9 }
  0x62   : > { %1297 = vmatpush3.bf16.msra.mxu0 %v364_v11  ;;  %s1506_s15 = scalar_lea.vmem %s1505_s9, 512  ;;  %p1507_p4 = scmp.lt.s32.totalorder %s1829_s14, %s1505_s9 }
  0x63   : > { %1311 = vmatpush3.bf16.msra.mxu1 %v451_v14  ;;  %1316 = vmatprep.subr.bf16.mxu0 %v1412_v12  ;;  %p1502_p2 = pnand %p1501_p12, %p1894_p1  ;;  %p1508_p7 = scmp.lt.s32.totalorder %s1506_s15, %s1500_s23 }
  0x64   : > { %758 = vmatprep.subr.bf16.mxu1 %v1576_v22 }
  0x65   : > { %1299 = vmatmul.mubr.msk.bf16.vlgmr.msra.gmra.mrb[0].mxu0 %vm355_vm0, %v1411_v13  ;;  %p1503_p3 = pneg %p1502_p2  ;;  %p1509_p8 = por %p1508_p7, %p1507_p4 }
  0x66   : > { %1313 = vmatmul.mubr.msk.bf16.vlgmr.msra.gmra.mrb[0].mxu1 %vm355_vm0, %v1411_v13  ;;  %1317 = vmatpush3.bf16.msra.mxu0 %v1412_v12 }
  0x67   : > { %1318 = vmatprep.subr.bf16.mxu0 %v1413_v15  ;;  %1326 = vmatprep.mubr.msk.bf16.mxu0 %vm355_vm0, %v1410_v8  ;;  %p1510_p11 = pnand %p1509_p8, %p1503_p3 }
  0x68   : > { %759 = vmatpush1.bf16.msra.mxu1 %v1417_v20 }
  0x69   : > { %760 = vmatprep.subr.bf16.mxu1 %v1576_v22 }
  0x6a   : > { %1319 = vmatpush3.bf16.msra.mxu0 %v1413_v15 }
  0x6b   : > { %1320 = vmatprep.subr.bf16.mxu0 %v1414_v16 }
  0x6c   : > { %761 = vmatpush1.bf16.msra.mxu1 %v1419_v24  ;;  %v1435_v24 = vld [vmem:[#allocation6 + $0x90] sm:$0xff]  }
  0x6d   : > { %762 = vmatprep.subr.bf16.mxu1 %v1576_v22 }
  0x6e   : > { %1321 = vmatpush3.bf16.msra.mxu0 %v1414_v16 }
  0x6f   : > { %1322 = vmatprep.subr.bf16.mxu0 %v1415_v17 }
  0x70   : > { %763 = vmatpush1.bf16.msra.mxu1 %v1421_v26  ;;  %v1436_v26 = vld [vmem:[#allocation6 + $0x98] sm:$0xff]  }
  0x71   : > { %764 = vmatprep.subr.bf16.mxu1 %v1576_v22 }
  0x72   : > { %1323 = vmatpush3.bf16.msra.mxu0 %v1415_v17 }
  0x73   : > { %1332 = vmatprep.subr.msk.bf16.mxu0 %vm362_vm1, %v1416_v18 }
  0x74   : > { %765 = vmatpush1.bf16.msra.mxu1 %v1423_v28  ;;  %v1437_v28 = vld [vmem:[#allocation6 + $0xa0] sm:$0xff]  }
  0x75   : > { %766 = vmatprep.subr.bf16.mxu1 %v1576_v22 }
  0x76   : > { %1325 = vmatpush3.bf16.msra.mxu0 %v539_v19 }
  0x77   : > { %878 = vmatprep.subr.bf16.mxu0 %v1576_v22 }
  0x78   : > { %767 = vmatpush1.bf16.msra.mxu1 %v1425_v30  ;;  %v1438_v30 = vld [vmem:[#allocation6 + $0xa8] sm:$0xff]  }
  0x79   : > { %1327 = vmatmul.mubr.msk.bf16.vlgmr.msra.gmra.mrb[4].mxu0 %vm355_vm0, %v1411_v13  ;;  %768 = vmatprep.subr.bf16.mxu1 %v1576_v22 }
  0x7a   : > { %879 = vmatpush1.bf16.msra.mxu0 %v1418_v21 }
  0x7b   : > { %880 = vmatprep.subr.bf16.mxu0 %v1576_v22 }
  0x7c   : > { %769 = vmatpush1.bf16.msra.mxu1 %v1427_v32  ;;  %v1440_v32 = vld [vmem:[#allocation6 + $0xb8] sm:$0xff]  }
  0x7d   : > { %770 = vmatprep.subr.bf16.mxu1 %v1576_v22 }
  0x7e   : > { %881 = vmatpush1.bf16.msra.mxu0 %v1420_v25 }
  0x7f   : > { %882 = vmatprep.subr.bf16.mxu0 %v1576_v22 }
  0x80   : > { %771 = vmatpush1.bf16.msra.mxu1 %v1429_v56 }
  0x81   : > { %772 = vmatprep.subr.bf16.mxu1 %v1576_v22 }
  0x82   : > { %883 = vmatpush1.bf16.msra.mxu0 %v1422_v27 }
  0x83   : > { %884 = vmatprep.subr.bf16.mxu0 %v1576_v22 }
  0x84   : > { %773 = vmatpush1.bf16.msra.mxu1 %v1431_v0 }
  0x85   : > { %774 = vmatprep.subr.bf16.mxu1 %v1576_v22 }
  0x86   : > { %885 = vmatpush1.bf16.msra.mxu0 %v1424_v29 }
  0x87   : > { %886 = vmatprep.subr.bf16.mxu0 %v1576_v22 }
  0x88   : > { %775 = vmatpush1.bf16.msra.mxu1 %v1433_v4 }
  0x89   : > { %999 = vmatprep.subr.bf16.mxu1 %v1576_v22 }
  0x8a   : > { %887 = vmatpush1.bf16.msra.mxu0 %v1426_v31  ;;  %v1439_v31 = vld [vmem:[#allocation6 + $0xb0] sm:$0xff]  }
  0x8b   : > { %888 = vmatprep.subr.bf16.mxu0 %v1576_v22 }
  0x8e   : > { %889 = vmatpush1.bf16.msra.mxu0 %v1428_v52 }
  0x8f   : > { %890 = vmatprep.subr.bf16.mxu0 %v1576_v22 }
  0x92   : > { %891 = vmatpush1.bf16.msra.mxu0 %v1430_v62 }
  0x93   : > { %892 = vmatprep.subr.bf16.mxu0 %v1576_v22 }
  0x96   : > { %893 = vmatpush1.bf16.msra.mxu0 %v1432_v3  ;;  %v1260_v3 = vld [vmem:[%s1879_s6] ss:$0 sm:$0xff] }
  0x97   : > { %894 = vmatprep.subr.bf16.mxu0 %v1576_v22 }
  0x9a   : > { %895 = vmatpush1.bf16.msra.mxu0 %v1434_v9 }
 0x138   : > { %v1300_v33 = vpop.f32.mrb[0].mxu0 }
 0x139   : > { %v1314_v34 = vpop.f32.mrb[0].mxu1  ;;  %v400_v35 = vpop.f32.mrb[1].mxu0  ;;  %v1441_v33 = vld [vmem:[#allocation6 + $0xc0] sm:$0xff]  }
 0x13a   : > { %v487_v36 = vpop.f32.mrb[1].mxu1  ;;  %v1301_v37 = vpop.f32.mrb[2].mxu0  ;;  %v596_v38 = vrot.slane %v1314_v34, 1  ;;  %v1442_v34 = vld [vmem:[#allocation6 + $0xc8] sm:$0xff]  }
 0x13b   : > { %v593_v39 = vrot.slane %v487_v36, 1  ;;  %v1315_v40 = vpop.f32.mrb[2].mxu1  ;;  %v403_v41 = vpop.f32.mrb[3].mxu0 }
 0x13c   : > { %v490_v42 = vpop.f32.mrb[3].mxu1 }
 0x13d   : > { %v594_v43 = vrot.slane %v490_v42, 1 }
 0x13f   : > { %v595_v44 = vsel %vm592_vm3, %v593_v39, %v594_v43  ;;  %v597_v45 = vsel %vm592_vm3, %v594_v43, %v596_v38 }
 0x140   : > { %v600_v46 = vadd.f32 %v595_v44, %v400_v35  ;;  %v601_v47 = vadd.f32 %v597_v45, %v403_v41  ;;  %v1443_v35 = vld [vmem:[#allocation6 + $0xd0] sm:$0xff]  }
 0x14c   : > { %v1328_v48 = vpop.f32.mrb[4].mxu0 }
 0x14d   : > { %v575_v49 = vpop.f32.mrb[5].mxu0  ;;  %v609_v53 = vrot.slane %v1328_v48, 2 }
 0x14e   : > { %v1329_v50 = vpop.f32.mrb[6].mxu0  ;;  %v606_v54 = vrot.slane %v575_v49, 2 }
 0x14f   : > { %v578_v51 = vpop.f32.mrb[7].mxu0 }
 0x150   : > { %v607_v55 = vrot.slane %v578_v51, 2 }
 0x152   : > { %v608_v57 = vsel %vm605_vm4, %v606_v54, %v607_v55  ;;  %v610_v58 = vsel %vm605_vm4, %v607_v55, %v609_v53 }
 0x153   : > { %v613_v60 = vadd.f32 %v608_v57, %v600_v46  ;;  %v614_v61 = vadd.f32 %v610_v58, %v601_v47 }
 0x155   : > { %v623_v1 = vmul.f32 %v1224_v59, %v614_v61  ;;  %v622_v2 = vmul.f32 %v1224_v59, %v613_v60 }
 0x157   : > { %v632_v5 = vadd.f32 %v1225_v63, %v623_v1  ;;  %v631_v6 = vadd.f32 %v1225_v63, %v622_v2  ;;  %v1259_v1 = vld [vmem:[%s1878_s5] ss:$0 sm:$0xff] }
 0x159   : > { %v634_v7 = vmax.f32 %v632_v5, 0.0  ;;  %v633_v8 = vmax.f32 %v631_v6, 0.0 }
 0x15b   : > { %v647_v10 = vrot.slane %v634_v7, 7  ;;  %v646_v11 = vrot.slane %v633_v8, 7 }
 0x15d   : > { %653 = vrot.lane.b32.xlu1 %v647_v10, %s1578_s29  ;;  %649 = vrot.lane.b32.xlu0 %v646_v11, %s1578_s29  ;;  %v648_v12 = vsel %vm645_vm6, %v646_v11, %v647_v10 }
 0x161   : > { %651 = vrot.lane.b32.xlu0 %v648_v12, %s1578_s29 }
 0x1cf   : > { %v654_v13 = vpop.permute.xlu1 %653  ;;  %v650_v14 = vpop.permute.xlu0 %649 }
 0x1d0   : > { %667 = vst.msk [vmem:[#allocation2 + $0x20] sm:$0x1] %vm666_vm7, %v654_v13 }
 0x1d1   : > { %669 = vst.msk [vmem:[#allocation2 + $0x28] sm:$0x1] %vm668_vm8, %v654_v13 }
 0x1d2   : > { %659 = vst.msk [vmem:[#allocation2] sm:$0xfe] %vm658_vm9, %v650_v14 }
 0x1d3   : > { %661 = vst.msk [vmem:[#allocation2 + $0x8] sm:$0xfe] %vm660_vm10, %v650_v14  ;;  %v652_v15 = vpop.permute.xlu0 %651 }
 0x1d4   : > { %663 = vst.msk [vmem:[#allocation2 + $0x10] sm:$0xff] %vm662_vm11, %v652_v15 }
 0x1d5   : > { %665 = vst.msk [vmem:[#allocation2 + $0x18] sm:$0xff] %vm664_vm12, %v652_v15 }
 0x1d7   : > { %v674_v27 = vld [vmem:[#allocation2 + $0x20] sm:$0x3] }
 0x1d8   : > { %v675_v20 = vld [vmem:[#allocation2 + $0x28] sm:$0x3]  ;;  %v678_v29 = vpack.c.bf16 %v674_v27, %v674_v27 }
 0x1d9   : > { %v670_v17 = vld [vmem:[#allocation2] sm:$0xff]  ;;  %v679_v25 = vpack.c.bf16 %v675_v20, %v675_v20 }
 0x1da   : > { %v671_v16 = vld [vmem:[#allocation2 + $0x8] sm:$0xff] }
 0x1db   : > { %v672_v19 = vld [vmem:[#allocation2 + $0x10] sm:$0xff] }
 0x1dc   : > { %v673_v18 = vld [vmem:[#allocation2 + $0x18] sm:$0xff]  ;;  %v676_v23 = vpack.c.bf16 %v672_v19, %v670_v17 }
 0x1dd   : > { %v677_v21 = vpack.c.bf16 %v673_v18, %v671_v16 }
 0x1df   : > { %1235 = vmatprep.mubr.msk.bf16.mxu1 %vm636_vm5, %v677_v21  ;;  %1246 = vmatprep.mubr.msk.bf16.mxu0 %vm636_vm5, %v677_v21 }
 0x1e0   : > { %791 = vmatmul.mubr.bf16.vlgmr.msra.gmra.mrb[4].mxu1 %v676_v23  ;;  %911 = vmatmul.mubr.bf16.vlgmr.msra.gmra.mrb[8].mxu0 %v676_v23 }
 0x1e1   : > { %1000 = vmatpush1.bf16.msra.mxu1 %v1435_v24  ;;  %1236 = vmatprep.mubr.msk.bf16.mxu1 %vm636_vm5, %v679_v25 }
 0x1e2   : > { %1247 = vmatprep.mubr.msk.bf16.mxu0 %vm636_vm5, %v679_v25  ;;  %1001 = vmatprep.subr.bf16.mxu1 %v1576_v22 }
 0x1e5   : > { %1002 = vmatpush1.bf16.msra.mxu1 %v1436_v26 }
 0x1e6   : > { %1003 = vmatprep.subr.bf16.mxu1 %v1576_v22 }
 0x1e8   : > { %799 = vmatmul.mubr.bf16.gmra.mrb[8].mxu1 %v678_v29  ;;  %919 = vmatmul.mubr.bf16.gmra.mrb[12].mxu0 %v678_v29 }
 0x1e9   : > { %1004 = vmatpush1.bf16.msra.mxu1 %v1437_v28  ;;  %1257 = vmatprep.mubr.msk.bf16.mxu1 %vm636_vm5, %v677_v21 }
 0x1ea   : > { %1005 = vmatprep.subr.bf16.mxu1 %v1576_v22 }
 0x1ed   : > { %1006 = vmatpush1.bf16.msra.mxu1 %v1438_v30 }
 0x1ee   : > { %1007 = vmatprep.subr.bf16.mxu1 %v1576_v22 }
 0x1f1   : > { %1008 = vmatpush1.bf16.msra.mxu1 %v1439_v31 }
 0x1f2   : > { %1009 = vmatprep.subr.bf16.mxu1 %v1576_v22 }
 0x1f5   : > { %1010 = vmatpush1.bf16.msra.mxu1 %v1440_v32 }
 0x1f6   : > { %1011 = vmatprep.subr.bf16.mxu1 %v1576_v22 }
 0x1f9   : > { %1012 = vmatpush1.bf16.msra.mxu1 %v1441_v33 }
 0x1fa   : > { %1013 = vmatprep.subr.bf16.mxu1 %v1576_v22 }
 0x1fd   : > { %1014 = vmatpush1.bf16.msra.mxu1 %v1442_v34 }
 0x1fe   : > { %1015 = vmatprep.subr.bf16.mxu1 %v1576_v22 }
 0x201   : > { %1016 = vmatpush1.bf16.msra.mxu1 %v1443_v35 }
 0x204   : > { %1032 = vmatmul.mubr.bf16.vlgmr.msra.gmra.mrb[12].mxu1 %v676_v23 }
 0x205   : > { %1258 = vmatprep.mubr.msk.bf16.mxu1 %vm636_vm5, %v679_v25 }
 0x20c   : > { %1040 = vmatmul.mubr.bf16.gmra.mrb[16].mxu1 %v678_v29 }
 0x2b3   : > { %v792_v36 = vpop.f32.mrb[4].mxu1  ;;  %v912_v37 = vpop.f32.mrb[8].mxu0 }
 0x2b4   : > { %v794_v38 = vpop.f32.mrb[5].mxu1  ;;  %v914_v39 = vpop.f32.mrb[9].mxu0  ;;  %v1050_v42 = vrot.slane %v912_v37, 1 }
 0x2b5   : > { %v795_v40 = vpop.f32.mrb[6].mxu1  ;;  %v915_v41 = vpop.f32.mrb[10].mxu0 }
 0x2b6   : > { %v1051_v43 = vrot.slane %v915_v41, 1  ;;  %v797_v44 = vpop.f32.mrb[7].mxu1  ;;  %v917_v45 = vpop.f32.mrb[11].mxu0 }
 0x2b8   : > { %v1052_v46 = vsel %vm592_vm3, %v1050_v42, %v1051_v43 }
 0x2b9   : > { %v1057_v47 = vadd.f32 %v1052_v46, %v792_v36 }
 0x2bb   : > { %v800_v48 = vpop.f32.mrb[8].mxu1  ;;  %v920_v22 = vpop.f32.mrb[12].mxu0 }
 0x2bc   : > { %v1053_v49 = vrot.slane %v920_v22, 1  ;;  %v801_v50 = vpop.f32.mrb[9].mxu1  ;;  %v922_v51 = vpop.f32.mrb[13].mxu0 }
 0x2bd   : > { %v802_v52 = vpop.f32.mrb[10].mxu1  ;;  %v923_v53 = vpop.f32.mrb[14].mxu0 }
 0x2be   : > { %v1054_v54 = vsel %vm592_vm3, %v1051_v43, %v1053_v49  ;;  %v803_v55 = vpop.f32.mrb[11].mxu1  ;;  %v924_v56 = vpop.f32.mrb[15].mxu0 }
 0x2bf   : > { %v1058_v57 = vadd.f32 %v1054_v54, %v795_v40 }
 0x2d7   : > { %v1033_v58 = vpop.f32.mrb[12].mxu1 }
 0x2d8   : > { %v1035_v59 = vpop.f32.mrb[13].mxu1  ;;  %v1062_v61 = vrot.slane %v1033_v58, 2 }
 0x2d9   : > { %v1036_v60 = vpop.f32.mrb[14].mxu1 }
 0x2da   : > { %v1063_v62 = vrot.slane %v1036_v60, 2  ;;  %v1038_v63 = vpop.f32.mrb[15].mxu1 }
 0x2dc   : > { %v1064_v0 = vsel %vm605_vm4, %v1062_v61, %v1063_v62 }
 0x2dd   : > { %v1069_v2 = vadd.f32 %v1064_v0, %v1057_v47 }
 0x2df   : > { %v1078_v4 = vmul.f32 %v1259_v1, %v1069_v2  ;;  %v1041_v5 = vpop.f32.mrb[16].mxu1 }
 0x2e0   : > { %v1065_v6 = vrot.slane %v1041_v5, 2  ;;  %v1043_v7 = vpop.f32.mrb[17].mxu1 }
 0x2e1   : > { %v1087_v8 = vadd.f32 %v1260_v3, %v1078_v4  ;;  %v1044_v9 = vpop.f32.mrb[18].mxu1 }
 0x2e2   : > { %v1066_v10 = vsel %vm605_vm4, %v1063_v62, %v1065_v6  ;;  %v1045_v11 = vpop.f32.mrb[19].mxu1 }
 0x2e3   : > { %v1089_v12 = vmax.f32 %v1087_v8, 0.0  ;;  %v1070_v13 = vadd.f32 %v1066_v10, %v1058_v57 }
 0x2e5   : > { %1091 = vst [vmem:[%s301_s13] sm:$0xff] %v1089_v12  ;;  %v1079_v14 = vmul.f32 %v1259_v1, %v1070_v13 }
 0x2e7   : > { %v1088_v15 = vadd.f32 %v1260_v3, %v1079_v14 }
 0x2e9   : > { %v1090_v16 = vmax.f32 %v1088_v15, 0.0 }
 0x2eb   : > { %1092 = vst [vmem:[%s301_s13 + $0x8] sm:$0xff] %v1090_v16 }
 0x2ec   : > { %1513 = shalt.err (!%p1510_p11)
}
 0x2ed   : > { %s1514_s8 = scalar_lea.hbm %s1827_s21, 256  ;;  %s1518_s16 = scalar_lea.hbm %s1880_s7, 512 }
 0x2ee   : > { %p1515_p13 = scmp.ne.s32.totalorder %s1827_s21, %s1514_s8  ;;  %p1519_p6 = scmp.lt.u32.totalorder %s1827_s21, %s1880_s7 }
 0x2ef   : > { %p1520_p9 = scmp.lt.u32.totalorder %s1518_s16, %s1514_s8  ;;  %p1522_p12 = scmp.lt.u32.totalorder %s1514_s8, %s1827_s21 }
 0x2f0   : > { %p1516_p5 = pnand %p1515_p13, %p1894_p1 }
 0x2f1   : > { %p1521_p10 = por %p1520_p9, %p1519_p6 }
 0x2f2   : > { %p1517_p0 = pneg %p1516_p5 }
 0x2f3   : > { %p1523_p2 = por %p1522_p12, %p1521_p10 }
 0x2f5   : > { %p1524_p3 = pnand %p1523_p2, %p1517_p0 }
 0x2f7   : > { %1527 = shalt.err (!%p1524_p3)
}
 0x2f8   : > { %s1580_s17 = smov 128  }
 0x2f9   : > { %1342 = dma.vmem_to_hbm [thread:$0]  (%p1894_p1), %s1829_s14, 256, %s1827_s21, %s1831_s22, %s1580_s17, %s1580_s17, %s1578_s29  }
 0x2fa PF: > { %p1359_p4 = scmp.ge.s32.totalorder %s1570_s27, 2  ;;  %s1122_s20 = sand.u32 1, %s1558_s24  }
 0x2fb   : > { %p1895_p7 = scmp.ne.s32.totalorder %s1886_s12, 0  ;;  %s1123_s23 = scalar_lea.sflag [#allocation5], %s1122_s20 }
 0x2fd   : > { %p1352_p8 = pnand %p1359_p4, %p1895_p7 }
 0x2ff   : > { %1553 = dma.done.wait (!%p1352_p8), %s1123_s23, 256  }
 0x300   : > { %1555 = vsyncadd (!%p1352_p8), %s1123_s23, 4294967040  ;;  %s1896_s11 = sld [smem:[#allocation12_spill]]  ;;  %p19_p11 = scmp.ge.s32.totalorder %s1646_s30, 4  }
 0x301   : > { %s1897_s24 = smov %s1562_s25  ;;  %s1898_s25 = smov %s1566_s26 }
 0x302   : > { %s1900_s27 = smov %s1646_s30  ;;  %21 = sbr.rel (!%p19_p11) target bundleno = 5 (0x5), region = 96 }
 0x306   : > { %s1899_s26 = smov %s1896_s11 }
 0x309   :  { %1128 = vsyncpa [#allocation4], 1 }
 0x30a   :  { %1130 = vsyncpa [#allocation4 + $0x1], 1 }
 0x30b   :  { %1131 = vsyncpa [#allocation7], 1 }
 0x30c   :  { %1132 = vsyncpa [#allocation5], 1 }
 0x30d   :  { %1134 = vsyncpa [#allocation5 + $0x1], 1 }

</bundles_post_ra>
